<compile_context>
chip_gen: v7x
topology: tpu7x:2x2x1
jax: 0.10.0
libtpu: 0.0.40
codegen_flags: <defaults>
</compile_context>

<pallas_src>
import numpy as np
import jax
import jax.numpy as jnp
from jax.experimental import pallas as pl
from jax.experimental.pallas import tpu as pltpu

STATE_DIM = 10
N_ACTION = 4
NB_NEURONS = 128
OUT_LANES = 128          # padded logit width used only in-register for the softmax
NEG_BIG = -1e30          # finite "-inf" for padded logits (exp underflows to exactly 0)

_TILE_CAP = 2048         # max rows per grid step (VMEM working set stays < ~10 MiB)
_MIN_SPLIT = 256         # above this, force >= 2 grid steps so v7x megacore sharding engages

UPPER = np.array(
    [2.5e11, 1.766e10, 8.0e8, 2.8256e7,       # p1, p1*, p2, p2*
     1.0e6, 5.0e4, 3.2e3, 8.0e1,              # T1, T1*, T2, T2*
     2.5e5, 3.532e5],                         # V, E
    dtype=np.float32,
)


def _policy_kernel(x_ref, w1_ref, b1_ref, w2_ref, b2_ref, w4_ref, b4_ref, o_ref):
    # fc1 + relu ('upper' normalization is folded into w1; bf16 x/weights, f32 accumulate)
    x = x_ref[...].astype(jnp.bfloat16)
    h1 = jnp.dot(x, w1_ref[...], preferred_element_type=jnp.float32) + b1_ref[...]
    h1 = jnp.maximum(h1, 0.0).astype(jnp.bfloat16)

    # fc2 + relu
    h2 = jnp.dot(h1, w2_ref[...], preferred_element_type=jnp.float32) + b2_ref[...]
    h2 = jnp.maximum(h2, 0.0).astype(jnp.bfloat16)

    # fc4, padded to 128 lanes in-register: columns >= N_ACTION have zero weights and
    # -1e30 bias, so they contribute exp(-huge) == 0 to the softmax denominator ->
    # softmax over 128 lanes == softmax over the 4 real actions.
    logits = jnp.dot(h2, w4_ref[...], preferred_element_type=jnp.float32) + b4_ref[...]

    m = jnp.max(logits, axis=1, keepdims=True)
    e = jnp.exp(logits - m)
    denom = jnp.sum(e, axis=1, keepdims=True)
    # Store only the N_ACTION real lanes (output block is (tile_b, 4)).
    o_ref[...] = e[:, :N_ACTION] * pl.reciprocal(denom, approx=True)


def _choose_tiling(batch):
    """Balanced, padding-aware batch tiling.

    Returns (tile_b, n_tiles) with tile_b a multiple of 8 and
    tile_b * n_tiles >= batch, minimizing padded rows.
    """
    b8 = ((batch + 7) // 8) * 8
    n_tiles = max(1, -(-b8 // _TILE_CAP))
    # v7x has 2 TensorCores; the "parallel" grid axis only helps with >= 2 steps.
    if n_tiles == 1 and b8 >= _MIN_SPLIT:
        n_tiles = 2
    tile_b = ((-(-b8 // n_tiles)) + 7) // 8 * 8
    return tile_b, n_tiles


def policy_forward(x, folded_params):
    """x: (B, STATE_DIM) or (STATE_DIM,) f32 -> (B, N_ACTION) softmax probabilities."""
    if x.ndim == 1:
        x = x[None, :]
    x = x.astype(jnp.float32)
    B = x.shape[0]
    w1, b1, w2, b2, w4p, b4p = folded_params

    tile_b, n_tiles = _choose_tiling(B)
    b_pad = tile_b * n_tiles
    if b_pad != B:
        x = jnp.pad(x, ((0, b_pad - B), (0, 0)))

    # Weights / biases: single full-extent block, constant index -> resident in VMEM.
    resident = lambda shape: pl.BlockSpec(shape, lambda i: (0, 0))

    out = pl.pallas_call(
        _policy_kernel,
        out_shape=jax.ShapeDtypeStruct((b_pad, N_ACTION), jnp.float32),
        grid=(n_tiles,),
        in_specs=[
            pl.BlockSpec((tile_b, STATE_DIM), lambda i: (i, 0)),   # x tile streams per step
            resident(w1.shape), resident(b1.shape),
            resident(w2.shape), resident(b2.shape),
            resident(w4p.shape), resident(b4p.shape),
        ],
        out_specs=pl.BlockSpec((tile_b, N_ACTION), lambda i: (i, 0)),
        compiler_params=pltpu.CompilerParams(
            dimension_semantics=("parallel",),     # megacore-shard the batch axis (v7x)
            vmem_limit_bytes=32 << 20,
        ),
    )(x, w1, b1, w2, b2, w4p, b4p)

    return out[:B]


def init_params(key, nb_neurons=NB_NEURONS):
    """Deterministic init mimicking PyTorch nn.Linear (uniform +/- 1/sqrt(fan_in))."""
    ks = jax.random.split(key, 6)

    def linear(kw, kb, fan_in, fan_out):
        bound = 1.0 / np.sqrt(fan_in)
        # stored as (in, out) so the kernel computes x @ W
        w = jax.random.uniform(kw, (fan_in, fan_out), jnp.float32, -bound, bound)
        b = jax.random.uniform(kb, (1, fan_out), jnp.float32, -bound, bound)
        return w, b

    w1, b1 = linear(ks[0], ks[1], STATE_DIM, nb_neurons)
    w2, b2 = linear(ks[2], ks[3], nb_neurons, nb_neurons)
    w4, b4 = linear(ks[4], ks[5], nb_neurons, N_ACTION)
    upper = jnp.asarray(UPPER).reshape(1, STATE_DIM)
    return (upper, w1, b1, w2, b2, w4, b4)


def fold_params(params):
    """One-time parameter prep (not per call):
       - fold the 'upper' normalization into w1,
       - pad fc4 to a 128-wide logit row (zero weights, -1e30 bias) for the
         in-register full-lane softmax,
       - cast weights to bf16 (native MXU input); biases stay f32."""
    upper, w1, b1, w2, b2, w4, b4 = params
    w1f = (w1 / upper.reshape(STATE_DIM, 1)).astype(jnp.bfloat16)
    w2b = w2.astype(jnp.bfloat16)
    n_in, n_act = w4.shape
    w4p = (jnp.zeros((n_in, OUT_LANES), jnp.float32).at[:, :n_act].set(w4)
           ).astype(jnp.bfloat16)
    b4p = jnp.full((1, OUT_LANES), NEG_BIG, jnp.float32).at[:, :n_act].set(b4)
    return (w1f, b1, w2b, b2, w4p, b4p)


def reference_forward(x, params):
    """Pure-JAX f32 reference replicating the PyTorch forward exactly."""
    if x.ndim == 1:
        x = x[None, :]
    upper, w1, b1, w2, b2, w4, b4 = params
    x = x / upper
    h1 = jnp.maximum(x @ w1 + b1, 0.0)
    h2 = jnp.maximum(h1 @ w2 + b2, 0.0)
    logits = h2 @ w4 + b4
    return jax.nn.softmax(logits, axis=1)


# TODO(synk): sample_action / Categorical sampling is host-side RNG on the returned
# probabilities and is intentionally not part of the forward kernel.

if __name__ == "__main__":
    key = jax.random.PRNGKey(0)
    k_params, k_x, k_x2 = jax.random.split(key, 3)

    params = init_params(k_params)
    folded = fold_params(params)

    # bf16 weights + approx reciprocal -> looser tolerances than pure f32.
    RTOL, ATOL = 4e-2, 2e-3

    # --- small batch (primary test, matches the original PyTorch usage) ---
    B = 2
    x = jax.random.uniform(k_x, (B, STATE_DIM), jnp.float32, 0.0, 1.0)
    x = x * jnp.asarray(UPPER)[None, :]   # scale roughly into the physical ranges

    probs = jax.block_until_ready(policy_forward(x, folded))
    ref = reference_forward(x, params)
    np.testing.assert_allclose(np.asarray(probs), np.asarray(ref), rtol=RTOL, atol=ATOL)
    np.testing.assert_allclose(np.asarray(probs).sum(axis=1),
                               np.ones(B, np.float32), rtol=0, atol=5e-3)

    # --- larger batch: exercises multi-tile grid + balanced tail padding path ---
    B2 = 600
    x2 = jax.random.uniform(k_x2, (B2, STATE_DIM), jnp.float32, 0.0, 1.0)
    x2 = x2 * jnp.asarray(UPPER)[None, :]
    probs2 = jax.block_until_ready(policy_forward(x2, folded))
    ref2 = reference_forward(x2, params)
    np.testing.assert_allclose(np.asarray(probs2), np.asarray(ref2), rtol=RTOL, atol=ATOL)
    np.testing.assert_allclose(np.asarray(probs2).sum(axis=1),
                               np.ones(B2, np.float32), rtol=0, atol=5e-3)

    print("KERNEL_OK")
</pallas_src>

<mosaic_0001>
module attributes {stable_mosaic.version = 11 : i64} {
  func.func @_policy_kernel(%arg0: i32, %arg1: memref<8x10xf32, #tpu.memory_space<vmem>>, %arg2: memref<10x128xbf16, #tpu.memory_space<vmem>>, %arg3: memref<1x128xf32, #tpu.memory_space<vmem>>, %arg4: memref<128x128xbf16, #tpu.memory_space<vmem>>, %arg5: memref<1x128xf32, #tpu.memory_space<vmem>>, %arg6: memref<128x128xbf16, #tpu.memory_space<vmem>>, %arg7: memref<1x128xf32, #tpu.memory_space<vmem>>, %arg8: memref<8x4xf32, #tpu.memory_space<vmem>>) attributes {dimension_semantics = [#tpu.dimension_semantics<parallel>], iteration_bounds = array<i64: 1>, scalar_prefetch = 0 : i64, scratch_operands = 0 : i64, tpu.core_type = #tpu.core_type<tc>, window_params = [{transform_indices = @transform_0, window_bounds = array<i64: 8, 10>}, {pipeline_mode = #tpu.pipeline_mode<synchronous>, transform_indices = @transform_1, window_bounds = array<i64: 10, 128>}, {pipeline_mode = #tpu.pipeline_mode<synchronous>, transform_indices = @transform_2, window_bounds = array<i64: 1, 128>}, {pipeline_mode = #tpu.pipeline_mode<synchronous>, transform_indices = @transform_3, window_bounds = array<i64: 128, 128>}, {pipeline_mode = #tpu.pipeline_mode<synchronous>, transform_indices = @transform_4, window_bounds = array<i64: 1, 128>}, {pipeline_mode = #tpu.pipeline_mode<synchronous>, transform_indices = @transform_5, window_bounds = array<i64: 128, 128>}, {pipeline_mode = #tpu.pipeline_mode<synchronous>, transform_indices = @transform_6, window_bounds = array<i64: 1, 128>}, {transform_indices = @transform_7, window_bounds = array<i64: 8, 4>}]} {
    %c0 = arith.constant 0 : index
    %c0_0 = arith.constant 0 : index
    %0 = vector.load %arg1[%c0, %c0_0] : memref<8x10xf32, #tpu.memory_space<vmem>>, vector<8x10xf32>
    %1 = arith.truncf %0 : vector<8x10xf32> to vector<8x10xbf16>
    %c0_1 = arith.constant 0 : index
    %c0_2 = arith.constant 0 : index
    %2 = vector.load %arg2[%c0_1, %c0_2] : memref<10x128xbf16, #tpu.memory_space<vmem>>, vector<10x128xbf16>
    %cst = arith.constant dense<0.000000e+00> : vector<8x128xf32>
    %3 = tpu.matmul %1, %2, %cst {dimension_numbers = #tpu.dot_dimension_numbers<[1], [0], [0], [1], [0, 0, 1, 1], [], []>} : vector<8x10xbf16>, vector<10x128xbf16>, vector<8x128xf32> -> vector<8x128xf32>
    %c0_3 = arith.constant 0 : index
    %c0_4 = arith.constant 0 : index
    %4 = vector.load %arg3[%c0_3, %c0_4] : memref<1x128xf32, #tpu.memory_space<vmem>>, vector<1x128xf32>
    %5 = vector.broadcast %4 : vector<1x128xf32> to vector<8x128xf32>
    %6 = arith.addf %3, %5 : vector<8x128xf32>
    %cst_5 = arith.constant 0.000000e+00 : f32
    %7 = vector.broadcast %cst_5 : f32 to vector<8x128xf32>
    %8 = arith.maximumf %6, %7 : vector<8x128xf32>
    %9 = arith.truncf %8 : vector<8x128xf32> to vector<8x128xbf16>
    %c0_6 = arith.constant 0 : index
    %c0_7 = arith.constant 0 : index
    %10 = vector.load %arg4[%c0_6, %c0_7] : memref<128x128xbf16, #tpu.memory_space<vmem>>, vector<128x128xbf16>
    %cst_8 = arith.constant dense<0.000000e+00> : vector<8x128xf32>
    %11 = tpu.matmul %9, %10, %cst_8 {dimension_numbers = #tpu.dot_dimension_numbers<[1], [0], [0], [1], [0, 0, 1, 1], [], []>} : vector<8x128xbf16>, vector<128x128xbf16>, vector<8x128xf32> -> vector<8x128xf32>
    %c0_9 = arith.constant 0 : index
    %c0_10 = arith.constant 0 : index
    %12 = vector.load %arg5[%c0_9, %c0_10] : memref<1x128xf32, #tpu.memory_space<vmem>>, vector<1x128xf32>
    %13 = vector.broadcast %12 : vector<1x128xf32> to vector<8x128xf32>
    %14 = arith.addf %11, %13 : vector<8x128xf32>
    %cst_11 = arith.constant 0.000000e+00 : f32
    %15 = vector.broadcast %cst_11 : f32 to vector<8x128xf32>
    %16 = arith.maximumf %14, %15 : vector<8x128xf32>
    %17 = arith.truncf %16 : vector<8x128xf32> to vector<8x128xbf16>
    %c0_12 = arith.constant 0 : index
    %c0_13 = arith.constant 0 : index
    %18 = vector.load %arg6[%c0_12, %c0_13] : memref<128x128xbf16, #tpu.memory_space<vmem>>, vector<128x128xbf16>
    %cst_14 = arith.constant dense<0.000000e+00> : vector<8x128xf32>
    %19 = tpu.matmul %17, %18, %cst_14 {dimension_numbers = #tpu.dot_dimension_numbers<[1], [0], [0], [1], [0, 0, 1, 1], [], []>} : vector<8x128xbf16>, vector<128x128xbf16>, vector<8x128xf32> -> vector<8x128xf32>
    %c0_15 = arith.constant 0 : index
    %c0_16 = arith.constant 0 : index
    %20 = vector.load %arg7[%c0_15, %c0_16] : memref<1x128xf32, #tpu.memory_space<vmem>>, vector<1x128xf32>
    %21 = vector.broadcast %20 : vector<1x128xf32> to vector<8x128xf32>
    %22 = arith.addf %19, %21 : vector<8x128xf32>
    %cst_17 = arith.constant dense<0xFF800000> : vector<8xf32>
    %23 = vector.multi_reduction <maximumf>, %22, %cst_17 [1] : vector<8x128xf32> to vector<8xf32>
    %24 = vector.shape_cast %23 : vector<8xf32> to vector<8x1xf32>
    %25 = vector.broadcast %24 : vector<8x1xf32> to vector<8x128xf32>
    %26 = arith.subf %22, %25 : vector<8x128xf32>
    %27 = math.exp %26 : vector<8x128xf32>
    %cst_18 = arith.constant dense<0.000000e+00> : vector<8xf32>
    %28 = vector.multi_reduction <add>, %27, %cst_18 [1] : vector<8x128xf32> to vector<8xf32>
    %29 = vector.shape_cast %28 : vector<8xf32> to vector<8x1xf32>
    %30 = vector.extract_strided_slice %27 {offsets = [0, 0], sizes = [8, 4], strides = [1, 1]} : vector<8x128xf32> to vector<8x4xf32>
    %31 = tpu.reciprocal %29 {approx = true} : vector<8x1xf32> -> vector<8x1xf32>
    %32 = vector.broadcast %31 : vector<8x1xf32> to vector<8x4xf32>
    %33 = arith.mulf %30, %32 : vector<8x4xf32>
    %c0_19 = arith.constant 0 : index
    %c0_20 = arith.constant 0 : index
    %34 = vector.load %arg8[%c0_19, %c0_20] : memref<8x4xf32, #tpu.memory_space<vmem>>, vector<8x4xf32>
    tpu.vector_store %arg8[%c0_19, %c0_20], %33 {strides = array<i32>} : memref<8x4xf32, #tpu.memory_space<vmem>>, vector<8x4xf32>,
    return
  }
  func.func @transform_0(%arg0: i32) -> (i32, i32) {
    %c0_i32 = arith.constant 0 : i32
    %c0_i32_0 = arith.constant 0 : i32
    return %arg0, %c0_i32 : i32, i32
  }
  func.func @transform_1(%arg0: i32) -> (i32, i32) {
    %c0_i32 = arith.constant 0 : i32
    %c0_i32_0 = arith.constant 0 : i32
    %c0_i32_1 = arith.constant 0 : i32
    return %c0_i32, %c0_i32_0 : i32, i32
  }
  func.func @transform_2(%arg0: i32) -> (i32, i32) {
    %c0_i32 = arith.constant 0 : i32
    %c0_i32_0 = arith.constant 0 : i32
    %c0_i32_1 = arith.constant 0 : i32
    return %c0_i32, %c0_i32_0 : i32, i32
  }
  func.func @transform_3(%arg0: i32) -> (i32, i32) {
    %c0_i32 = arith.constant 0 : i32
    %c0_i32_0 = arith.constant 0 : i32
    %c0_i32_1 = arith.constant 0 : i32
    return %c0_i32, %c0_i32_0 : i32, i32
  }
  func.func @transform_4(%arg0: i32) -> (i32, i32) {
    %c0_i32 = arith.constant 0 : i32
    %c0_i32_0 = arith.constant 0 : i32
    %c0_i32_1 = arith.constant 0 : i32
    return %c0_i32, %c0_i32_0 : i32, i32
  }
  func.func @transform_5(%arg0: i32) -> (i32, i32) {
    %c0_i32 = arith.constant 0 : i32
    %c0_i32_0 = arith.constant 0 : i32
    %c0_i32_1 = arith.constant 0 : i32
    return %c0_i32, %c0_i32_0 : i32, i32
  }
  func.func @transform_6(%arg0: i32) -> (i32, i32) {
    %c0_i32 = arith.constant 0 : i32
    %c0_i32_0 = arith.constant 0 : i32
    %c0_i32_1 = arith.constant 0 : i32
    return %c0_i32, %c0_i32_0 : i32, i32
  }
  func.func @transform_7(%arg0: i32) -> (i32, i32) {
    %c0_i32 = arith.constant 0 : i32
    %c0_i32_0 = arith.constant 0 : i32
    return %arg0, %c0_i32 : i32, i32
  }
}

</mosaic_0001>

<bundles_post_ra>
// kernel: tpu_custom_call.1
= control target key start
LH: loop header
LB: loop body
LE: loop exit
PB: predicated region body
PF: predicated region fallthrough
CT: control target
= control target key end

     0   :  { %12 = vsyncpa [#allocation3], 0  ;;  %s738_s0 = inlined_call_operand.hbm [shape: f32[8,10], index: 0, kind: input, shape index: {}]   ;;  %s739_s1 = inlined_call_operand.hbm [shape: bf16[10,128], index: 1, kind: input, shape index: {}]   ;;  %s740_s2 = inlined_call_operand.vmem [shape: f32[1,128], index: 2, kind: input, shape index: {}]   ;;  %s741_s3 = inlined_call_operand.hbm [shape: bf16[128,128], index: 3, kind: input, shape index: {}]   ;;  %s742_s4 = inlined_call_operand.vmem [shape: f32[1,128], index: 4, kind: input, shape index: {}]   ;;  %s743_s5 = inlined_call_operand.hbm [shape: bf16[128,128], index: 5, kind: input, shape index: {}]   ;;  %s744_s6 = inlined_call_operand.vmem [shape: f32[1,128], index: 6, kind: input, shape index: {}]   ;;  %s745_s7 = inlined_call_operand.vmem [shape: f32[8,4], index: 7, kind: output, shape index: {}]  }
   0x1   :  { %13 = vsyncpa [#allocation5], 0 }
   0x2   :  { %14 = vsyncpa [#allocation8], 0  ;;  %s598_s24 = smov [#allocation4]   ;;  %s504_s28 = scalar_lea.hbm %s739_s1, 128 }
   0x3   :  { %s30_s25 = sshll.u32 %s598_s24, 4  ;;  %p505_p0 = scmp.ne.s32.totalorder %s739_s1, %s504_s28  ;;  %s31_s25 = int_to_ptr.vmem [resolvable:$true] %s30_s25 }
   0x4   :  { %p508_p1 = scmp.lt.u32.totalorder %s504_s28, %s739_s1 }
   0x6   :  { %p510_p2 = pnand %p508_p1, %p505_p0 }
   0x8   :  { %513 = shalt.err (!%p510_p2)
}
   0x9   :  { %s514_s10 = scalar_lea.vmem %s31_s25, 128  ;;  %p519_p4 = scmp.lt.s32.totalorder %s31_s25, %s31_s25 }
   0xa   :  { %p515_p3 = scmp.ne.s32.totalorder %s31_s25, %s514_s10  ;;  %p520_p5 = scmp.lt.s32.totalorder %s514_s10, %s514_s10 }
   0xc   :  { %p521_p6 = por %p520_p5, %p519_p4 }
   0xe   :  { %p522_p7 = pnand %p521_p6, %p515_p3 }
  0x10   :  { %525 = shalt.err (!%p522_p7)
}
  0x11   :  { %s599_s11 = smov 64   ;;  %s600_s12 = smov 4  }
  0x12   :  { %36 = dma.hbm_to_vmem [thread:$0]  %s739_s1, 128, %s31_s25, [#allocation5], %s599_s11, %s599_s11, %s600_s12  }
  0x13   :  { %s601_s15 = smov [#allocation2]   ;;  %s602_s17 = smov [#allocation6]  }
  0x14   :  { %s21_s16 = sshll.u32 %s601_s15, 4  ;;  %s44_s18 = sshll.u32 %s602_s17, 4  ;;  %s22_s16 = int_to_ptr.vmem [resolvable:$true] %s21_s16  ;;  %s45_s18 = int_to_ptr.vmem [resolvable:$true] %s44_s18 }
  0x15   :  { %s526_s21 = scalar_lea.hbm %s738_s0, 128 }
  0x16   :  { %p527_p8 = scmp.ne.s32.totalorder %s738_s0, %s526_s21  ;;  %p530_p9 = scmp.lt.u32.totalorder %s526_s21, %s738_s0 }
  0x18   :  { %p532_p10 = pnand %p530_p9, %p527_p8 }
  0x1a   :  { %535 = shalt.err (!%p532_p10)
}
  0x1b   :  { %s536_s1 = scalar_lea.vmem %s22_s16, 128  ;;  %p541_p12 = scmp.lt.s32.totalorder %s22_s16, %s22_s16 }
  0x1c   :  { %p537_p11 = scmp.ne.s32.totalorder %s22_s16, %s536_s1  ;;  %p542_p13 = scmp.lt.s32.totalorder %s536_s1, %s536_s1 }
  0x1e   :  { %p543_p0 = por %p542_p13, %p541_p12 }
  0x20   :  { %p544_p1 = pnand %p543_p0, %p537_p11 }
  0x22   :  { %547 = shalt.err (!%p544_p1)
}
  0x23   :  { %24 = dma.hbm_to_vmem [thread:$0]  %s738_s0, 128, %s22_s16, [#allocation3]  }
  0x24   :  { %s548_s30 = scalar_lea.hbm %s741_s3, 1024 }
  0x25   :  { %p549_p2 = scmp.ne.s32.totalorder %s741_s3, %s548_s30  ;;  %p552_p3 = scmp.lt.u32.totalorder %s548_s30, %s741_s3 }
  0x27   :  { %p554_p4 = pnand %p552_p3, %p549_p2 }
  0x29   :  { %557 = shalt.err (!%p554_p4)
}
  0x2a   :  { %s558_s14 = scalar_lea.vmem %s45_s18, 1024  ;;  %p563_p6 = scmp.lt.s32.totalorder %s45_s18, %s45_s18 }
  0x2b   :  { %p559_p5 = scmp.ne.s32.totalorder %s45_s18, %s558_s14  ;;  %p564_p7 = scmp.lt.s32.totalorder %s558_s14, %s558_s14 }
  0x2d   :  { %p565_p8 = por %p564_p7, %p563_p6 }
  0x2f   :  { %p566_p9 = pnand %p565_p8, %p559_p5 }
  0x31   :  { %569 = shalt.err (!%p566_p9)
}
  0x32   :  { %50 = dma.hbm_to_vmem [thread:$0]  %s741_s3, 1024, %s45_s18, [#allocation5], %s599_s11, %s599_s11, %s600_s12  }
  0x33   :  { %s603_s16 = smov [#allocation7]   ;;  %s570_s21 = scalar_lea.hbm %s743_s5, 1024 }
  0x34   :  { %s58_s17 = sshll.u32 %s603_s16, 4  ;;  %p571_p10 = scmp.ne.s32.totalorder %s743_s5, %s570_s21  ;;  %s59_s17 = int_to_ptr.vmem [resolvable:$true] %s58_s17 }
  0x35   :  { %p574_p11 = scmp.lt.u32.totalorder %s570_s21, %s743_s5 }
  0x37   :  { %p576_p12 = pnand %p574_p11, %p571_p10 }
  0x39   :  { %579 = shalt.err (!%p576_p12)
}
  0x3a   :  { %s580_s1 = scalar_lea.vmem %s59_s17, 1024  ;;  %p585_p0 = scmp.lt.s32.totalorder %s59_s17, %s59_s17 }
  0x3b   :  { %p581_p13 = scmp.ne.s32.totalorder %s59_s17, %s580_s1  ;;  %p586_p1 = scmp.lt.s32.totalorder %s580_s1, %s580_s1 }
  0x3d   :  { %p587_p2 = por %p586_p1, %p585_p0 }
  0x3f   :  { %p588_p3 = pnand %p587_p2, %p581_p13 }
  0x41   :  { %591 = shalt.err (!%p588_p3)
}
  0x42   :  { %64 = dma.hbm_to_vmem [thread:$0]  %s743_s5, 1024, %s59_s17, [#allocation8], %s599_s11, %s599_s11, %s600_s12  }
  0x43   :  { %592 = dma.done.wait [#allocation3], 128  }
  0x44   :  { %593 = vsyncadd [#allocation3], 4294967168 }
  0x45   :  { %594 = dma.done.wait [#allocation5], 1152  }
  0x46   :  { %595 = vsyncadd [#allocation5], 4294966144 }
  0x47   :  { %596 = dma.done.wait [#allocation8], 1024  }
  0x48   :  { %597 = vsyncadd [#allocation8], 4294966272  ;;  %v604_v0 = vmov 0.0   ;;  %vm605_vm0 = vmmov 0   ;;  %vm100_vm1 = vcmask 1044480   ;;  %v80_v2 = vld [vmem:[#allocation2] sm:$0xff] }
  0x49   :  { %429 = vmatprep.subr.bf16.mxu0 %v604_v0  ;;  %431 = vmatprep.mubr.msk.bf16.mxu0 %vm605_vm0, %v604_v0  ;;  %v483_v1 = vld [vmem:[#allocation4] sm:$0x1f]   ;;  %v81_v4 = vpack.c.bf16 %v80_v2, %v80_v2  ;;  %v484_v5 = vld [vmem:[#allocation6] sm:$0xff]   ;;  %vm96_vm2 = vcmask 80896   ;;  %v485_v6 = vld [vmem:[#allocation6 + $0x8] sm:$0xff]   ;;  %vm379_vm3 = vcmask 31744  }
  0x4a   :  { %435 = vmatprep.subr.bf16.mxu1 %v604_v0  ;;  %451 = vmatprep.mubr.msk.bf16.mxu1 %vm605_vm0, %v604_v0  ;;  %v102_v3 = vsel %vm100_vm1, %v483_v1, 0  ;;  %v486_v7 = vld [vmem:[#allocation6 + $0x10] sm:$0xff]   ;;  %v487_v8 = vld [vmem:[#allocation6 + $0x18] sm:$0xff]   ;;  %v488_v9 = vld [vmem:[#allocation6 + $0x20] sm:$0xff]  }
  0x4b   :  { %430 = vmatpush3.bf16.msra.mxu0 %v102_v3  ;;  %436 = vmatpush3.bf16.msra.mxu1 %v484_v5  ;;  %v489_v10 = vld [vmem:[#allocation6 + $0x28] sm:$0xff]   ;;  %v490_v11 = vld [vmem:[#allocation6 + $0x30] sm:$0xff]   ;;  %v491_v12 = vld [vmem:[#allocation6 + $0x38] sm:$0xff]  }
  0x4c   :  { %455 = vmatprep.subr.bf16.mxu0 %v604_v0  ;;  %437 = vmatprep.subr.bf16.mxu1 %v604_v0  ;;  %v492_v13 = vld [vmem:[#allocation7] sm:$0xff]   ;;  %v493_v14 = vld [vmem:[#allocation7 + $0x8] sm:$0xff]   ;;  %v494_v15 = vld [vmem:[#allocation7 + $0x10] sm:$0xff]  }
  0x4d   :  { %v495_v16 = vld [vmem:[#allocation7 + $0x18] sm:$0xff]   ;;  %v496_v17 = vld [vmem:[#allocation7 + $0x20] sm:$0xff]   ;;  %v497_v18 = vld [vmem:[#allocation7 + $0x28] sm:$0xff]  }
  0x4e   :  { %432 = vmatmul.mubr.msk.bf16.vlgmr.msra.gmra.mrb[0].mxu0 %vm96_vm2, %v81_v4  ;;  %v388_v19 = vld [vmem:[%s740_s2] ss:$0 sm:$0xff]  ;;  %v499_v28 = vld [vmem:[#allocation7 + $0x38] sm:$0xff]  }
  0x4f   :  { %471 = vmatprep.mubr.msk.bf16.mxu0 %vm605_vm0, %v604_v0  ;;  %438 = vmatpush3.bf16.msra.mxu1 %v485_v6  ;;  %v498_v27 = vld [vmem:[#allocation7 + $0x30] sm:$0xff]  }
  0x50   :  { %439 = vmatprep.subr.bf16.mxu1 %v604_v0  ;;  %456 = vmatpush3.bf16.msra.mxu0 %v492_v13  ;;  %v391_v29 = vld [vmem:[%s742_s4] ss:$0 sm:$0xff] }
  0x51   :  { %457 = vmatprep.subr.bf16.mxu0 %v604_v0  ;;  %v400_v37 = vld [vmem:[%s744_s6] ss:$0 sm:$0xff] }
  0x53   :  { %440 = vmatpush3.bf16.msra.mxu1 %v486_v7 }
  0x54   :  { %441 = vmatprep.subr.bf16.mxu1 %v604_v0  ;;  %458 = vmatpush3.bf16.msra.mxu0 %v493_v14 }
  0x55   :  { %459 = vmatprep.subr.bf16.mxu0 %v604_v0 }
  0x57   :  { %442 = vmatpush3.bf16.msra.mxu1 %v487_v8 }
  0x58   :  { %443 = vmatprep.subr.bf16.mxu1 %v604_v0  ;;  %460 = vmatpush3.bf16.msra.mxu0 %v494_v15 }
  0x59   :  { %461 = vmatprep.subr.bf16.mxu0 %v604_v0 }
  0x5b   :  { %444 = vmatpush3.bf16.msra.mxu1 %v488_v9 }
  0x5c   :  { %445 = vmatprep.subr.bf16.mxu1 %v604_v0  ;;  %462 = vmatpush3.bf16.msra.mxu0 %v495_v16 }
  0x5d   :  { %463 = vmatprep.subr.bf16.mxu0 %v604_v0 }
  0x5f   :  { %446 = vmatpush3.bf16.msra.mxu1 %v489_v10 }
  0x60   :  { %447 = vmatprep.subr.bf16.mxu1 %v604_v0  ;;  %464 = vmatpush3.bf16.msra.mxu0 %v496_v17 }
  0x61   :  { %465 = vmatprep.subr.bf16.mxu0 %v604_v0 }
  0x63   :  { %448 = vmatpush3.bf16.msra.mxu1 %v490_v11 }
  0x64   :  { %449 = vmatprep.subr.bf16.mxu1 %v604_v0  ;;  %466 = vmatpush3.bf16.msra.mxu0 %v497_v18 }
  0x65   :  { %467 = vmatprep.subr.bf16.mxu0 %v604_v0 }
  0x67   :  { %450 = vmatpush3.bf16.msra.mxu1 %v491_v12 }
  0x68   :  { %468 = vmatpush3.bf16.msra.mxu0 %v498_v27 }
  0x69   :  { %469 = vmatprep.subr.bf16.mxu0 %v604_v0 }
  0x6c   :  { %470 = vmatpush3.bf16.msra.mxu0 %v499_v28 }
 0x121   :  { %v138_v20 = vpop.f32.mrb[0].mxu0 }
 0x122   :  { %v139_v21 = vadd.f32 %v388_v19, %v138_v20  ;;  %v433_v22 = vpop.f32.mrb[1].mxu0 }
 0x123   :  { %v141_v23 = vpop.f32.mrb[2].mxu0 }
 0x124   :  { %v144_v24 = vmax.f32 %v139_v21, 0.0  ;;  %v434_v25 = vpop.f32.mrb[3].mxu0 }
 0x126   :  { %v145_v26 = vpack.c.bf16 %v144_v24, %v144_v24 }
 0x128   :  { %452 = vmatmul.mubr.bf16.vlgmr.msra.gmra.mrb[0].mxu1 %v145_v26 }
 0x1fb   :  { %v251_v30 = vpop.f32.mrb[0].mxu1 }
 0x1fc   :  { %v252_v31 = vadd.f32 %v391_v29, %v251_v30  ;;  %v453_v32 = vpop.f32.mrb[1].mxu1 }
 0x1fd   :  { %v254_v33 = vpop.f32.mrb[2].mxu1 }
 0x1fe   :  { %v257_v34 = vmax.f32 %v252_v31, 0.0  ;;  %v454_v35 = vpop.f32.mrb[3].mxu1 }
 0x200   :  { %v258_v36 = vpack.c.bf16 %v257_v34, %v257_v34 }
 0x202   :  { %472 = vmatmul.mubr.bf16.vlgmr.msra.gmra.mrb[4].mxu0 %v258_v36 }
 0x2d5   :  { %v364_v38 = vpop.f32.mrb[4].mxu0 }
 0x2d6   :  { %v365_v39 = vadd.f32 %v400_v37, %v364_v38  ;;  %v473_v40 = vpop.f32.mrb[5].mxu0 }
 0x2d7   :  { %v367_v41 = vpop.f32.mrb[6].mxu0 }
 0x2d8   :  { %370 = vmax.xlane.f32.xlu0 %v365_v39  ;;  %v474_v42 = vpop.f32.mrb[7].mxu0 }
 0x365   :  { %v371_v43 = vpop.xlane.xlu0 %370 }
 0x366   :  { %v372_v44 = vsub.f32 %v365_v39, %v371_v43 }
 0x368   :  { %v373_v45 = vmul.f32 1.442695, %v372_v44 }
 0x36a   :  { %500 = vpow2.f32 %v373_v45 }
 0x374   :  { %v501_v46 = vpop.eup %500 }
 0x375   :  { %375 = vadd.xlane.f32.xlu0 %v501_v46 }
 0x402   :  { %v376_v47 = vpop.xlane.xlu0 %375 }
 0x403   :  { %502 = vrcp.f32 %v376_v47 }
 0x40d   :  { %v503_v48 = vpop.eup %502 }
 0x40e   :  { %v378_v49 = vmul.f32 %v503_v48, %v501_v46 }
 0x410   :  { %380 = vst.msk [vmem:[%s745_s7] sm:$0xff] %vm379_vm3, %v378_v49 }
 0x411   :  { %385 = vsyncpa [#allocation3], 1 }
 0x412   :  { %386 = vsyncpa [#allocation5], 1 }
 0x413   :  { %387 = vsyncpa [#allocation8], 1 }

</bundles_post_ra>
